<compile_context>
chip_gen: v7x
topology: tpu7x:2x2x1
jax: 0.10.0
libtpu: 0.0.40
codegen_flags: <defaults>
</compile_context>

<pallas_src>
import math

import jax
import jax.numpy as jnp
from jax.experimental import pallas as pl
from jax.experimental.pallas import tpu as pltpu

# sqrt(2/pi) folded into the polynomial:
#   sqrt(2/pi) * (x + 0.044715*x^3)  ==  x * (C1 + C2*x^2)
_C1 = math.sqrt(2.0 / math.pi)
_C2 = 0.044715 * _C1

_TINY_FAST_PATH_ELEMS = 8192


def _cdiv(a, b):
    return -(-a // b)


def _round_up(a, m):
    return _cdiv(a, m) * m


def _gelu_f32(xf):
    inner = xf * (_C1 + _C2 * (xf * xf))
    return 0.5 * xf * (1.0 + jnp.tanh(inner))


def _gelu_kernel(x_ref, o_ref):
    # f32 compute regardless of storage dtype (exact vs reference; v5e has no
    # bf16 VPU/EUP).  tanh goes to the EUP slot, which has ample headroom.
    xf = x_ref[...].astype(jnp.float32)
    o_ref[...] = _gelu_f32(xf).astype(o_ref.dtype)


def _device_kind():
    try:
        return jax.devices()[0].device_kind.lower()
    except Exception:
        return ""


def gelu_pallas(x):
    """Elementwise GELU (tanh approximation) via a Pallas TPU kernel."""
    orig_shape = x.shape
    dtype = x.dtype
    total = math.prod(orig_shape) if len(orig_shape) > 0 else 1

    if total == 0:
        return x
    # Tiny-input fast path: fixed pallas_call cost dominates; fused XLA wins.
    if total <= _TINY_FAST_PATH_ELEMS:
        return _gelu_f32(x.astype(jnp.float32)).astype(dtype).reshape(orig_shape)

    itemsize = jnp.dtype(dtype).itemsize
    # Packed sublane tile height: 8 (f32), 16 (bf16), 32 (int8/fp8).
    sublane_mult = max(8, 32 // itemsize)

    # ---- lane-dense 2D layout: avoid wrapper-side pad/slice when possible ----
    lanes = None
    last = orig_shape[-1] if len(orig_shape) >= 1 else 1
    if last % 128 == 0 and 128 <= last <= 8192:
        lanes = last                      # trailing hidden dim (768, 1024, 3072, ...)
    else:
        for cand in (1024, 512, 256, 128):
            if total % cand == 0:
                lanes = cand
                break
    if lanes is not None:
        rows = total // lanes
        pad = 0
    else:
        # True fallback only: ragged total, pad minimally to a 128 multiple.
        lanes = 128
        rows = _cdiv(total, lanes)
        pad = rows * lanes - total

    # ---- chip-aware block sizing ---------------------------------------------
    kind = _device_kind()
    two_tc = "v7" in kind                  # v7x: 2 TensorCores, 64 MiB VMEM
    target_block_bytes = (2 << 20) if two_tc else (6 << 20)

    bytes_per_row = lanes * itemsize
    max_rows_per_block = max(
        sublane_mult,
        (target_block_bytes // bytes_per_row) // sublane_mult * sublane_mult,
    )

    if rows <= max_rows_per_block:
        # Single full-extent block (legal for any row count; no OOB, no padding).
        block_rows = rows
    else:
        block_rows = max_rows_per_block
    n_blocks = _cdiv(rows, block_rows)

    # v7x only: ensure >= ~4 blocks per TensorCore so the grid shards across
    # both cores and double-buffering hides the DMA latency.  On single-TC
    # chips the grid is a serial loop, so forced splitting is pure overhead.
    if two_tc:
        desired = 8
        if n_blocks < desired and rows >= desired * sublane_mult:
            block_rows = _round_up(_cdiv(rows, desired), sublane_mult)
            n_blocks = _cdiv(rows, block_rows)

    x_flat = x.reshape(-1)
    if pad:
        x_flat = jnp.pad(x_flat, (0, pad))
    x2d = x_flat.reshape(rows, lanes)

    block_bytes = block_rows * lanes * itemsize
    # in + out, double-buffered (~4x block) + headroom; safe on all generations.
    vmem_limit = int(min(48 << 20, max(8 << 20, 6 * block_bytes)))

    padded_total = rows * lanes
    cost = pl.CostEstimate(
        flops=8 * padded_total,
        transcendentals=padded_total,
        bytes_accessed=2 * padded_total * itemsize,
    )

    out2d = pl.pallas_call(
        _gelu_kernel,
        out_shape=jax.ShapeDtypeStruct((rows, lanes), dtype),
        grid_spec=pltpu.PrefetchScalarGridSpec(
            num_scalar_prefetch=0,
            grid=(n_blocks,),
            in_specs=[pl.BlockSpec((block_rows, lanes), lambda i: (i, 0))],
            out_specs=pl.BlockSpec((block_rows, lanes), lambda i: (i, 0)),
        ),
        compiler_params=pltpu.CompilerParams(
            dimension_semantics=("parallel",),
            vmem_limit_bytes=vmem_limit,
        ),
        cost_estimate=cost,
    )(x2d)

    out_flat = out2d.reshape(-1)
    if pad:
        out_flat = out_flat[:total]
    return out_flat.reshape(orig_shape)


def gelu_ref(x):
    """Pure-JAX reference matching the PyTorch module exactly."""
    return 0.5 * x * (1.0 + jnp.tanh(jnp.sqrt(2.0 / jnp.pi) * (x + 0.044715 * x ** 3)))


if __name__ == "__main__":
    key = jax.random.PRNGKey(0)

    # Small GPT-like activation shape: batch=2, seq=8, hidden=32 (fast path).
    x = jax.random.normal(key, (2, 8, 32), dtype=jnp.float32)
    y = gelu_pallas(x)
    jax.block_until_ready(y)
    assert y.shape == x.shape and y.dtype == x.dtype
    assert jnp.allclose(y, gelu_ref(x), atol=1e-5, rtol=1e-5), "mismatch (small)"

    # GPT-ish ragged seq with 128-multiple hidden dim (no-pad Pallas path).
    x2 = jax.random.normal(jax.random.PRNGKey(1), (3, 17, 768), dtype=jnp.float32)
    y2 = gelu_pallas(x2)
    jax.block_until_ready(y2)
    assert jnp.allclose(y2, gelu_ref(x2), atol=1e-5, rtol=1e-5), "mismatch (ragged rows)"

    # bf16 activations (dtype-aware sublane tiling path).
    x3 = jax.random.normal(jax.random.PRNGKey(2), (2, 128, 768), dtype=jnp.bfloat16)
    y3 = gelu_pallas(x3)
    jax.block_until_ready(y3)
    ref3 = gelu_ref(x3.astype(jnp.float32)).astype(jnp.bfloat16)
    assert y3.dtype == x3.dtype
    assert jnp.allclose(y3.astype(jnp.float32), ref3.astype(jnp.float32),
                        atol=2e-2, rtol=2e-2), "mismatch (bf16)"

    # Ragged total with no 128 divisor: exercises the pad fallback path.
    x4 = jax.random.normal(jax.random.PRNGKey(3), (3, 37, 101), dtype=jnp.float32)
    y4 = gelu_pallas(x4)
    jax.block_until_ready(y4)
    assert jnp.allclose(y4, gelu_ref(x4), atol=1e-5, rtol=1e-5), "mismatch (pad fallback)"

    print("KERNEL_OK")
</pallas_src>

<mosaic_0001>
module attributes {stable_mosaic.version = 11 : i64} {
  func.func @_gelu_kernel(%arg0: i32, %arg1: memref<51x768xf32, #tpu.memory_space<vmem>>, %arg2: memref<51x768xf32, #tpu.memory_space<vmem>>) attributes {dimension_semantics = [#tpu.dimension_semantics<parallel>], iteration_bounds = array<i64: 1>, scalar_prefetch = 0 : i64, scratch_operands = 0 : i64, tpu.core_type = #tpu.core_type<tc>, window_params = [{transform_indices = @transform_0, window_bounds = array<i64: 51, 768>}, {transform_indices = @transform_1, window_bounds = array<i64: 51, 768>}]} {
    %c0 = arith.constant 0 : index
    %c0_0 = arith.constant 0 : index
    %0 = vector.load %arg1[%c0, %c0_0] : memref<51x768xf32, #tpu.memory_space<vmem>>, vector<51x768xf32>
    %1 = arith.mulf %0, %0 : vector<51x768xf32>
    %cst = arith.constant 0.0356774069 : f32
    %2 = vector.broadcast %cst : f32 to vector<51x768xf32>
    %3 = arith.mulf %2, %1 : vector<51x768xf32>
    %cst_1 = arith.constant 0.797884583 : f32
    %4 = vector.broadcast %cst_1 : f32 to vector<51x768xf32>
    %5 = arith.addf %4, %3 : vector<51x768xf32>
    %6 = arith.mulf %0, %5 : vector<51x768xf32>
    %cst_2 = arith.constant 5.000000e-01 : f32
    %7 = vector.broadcast %cst_2 : f32 to vector<51x768xf32>
    %8 = arith.mulf %7, %0 : vector<51x768xf32>
    %9 = math.tanh %6 : vector<51x768xf32>
    %cst_3 = arith.constant 1.000000e+00 : f32
    %10 = vector.broadcast %cst_3 : f32 to vector<51x768xf32>
    %11 = arith.addf %10, %9 : vector<51x768xf32>
    %12 = arith.mulf %8, %11 : vector<51x768xf32>
    %c0_4 = arith.constant 0 : index
    %c0_5 = arith.constant 0 : index
    %13 = vector.load %arg2[%c0_4, %c0_5] : memref<51x768xf32, #tpu.memory_space<vmem>>, vector<51x768xf32>
    tpu.vector_store %arg2[%c0_4, %c0_5], %12 {strides = array<i32>} : memref<51x768xf32, #tpu.memory_space<vmem>>, vector<51x768xf32>,
    return
  }
  func.func @transform_0(%arg0: i32) -> (i32, i32) {
    %c0_i32 = arith.constant 0 : i32
    %c0_i32_0 = arith.constant 0 : i32
    return %arg0, %c0_i32 : i32, i32
  }
  func.func @transform_1(%arg0: i32) -> (i32, i32) {
    %c0_i32 = arith.constant 0 : i32
    %c0_i32_0 = arith.constant 0 : i32
    return %arg0, %c0_i32 : i32, i32
  }
}

</mosaic_0001>

<bundles_post_ra>
// kernel: tpu_custom_call.1
= control target key start
LH: loop header
LB: loop body
LE: loop exit
PB: predicated region body
PF: predicated region fallthrough
CT: control target
= control target key end

     0   :  { %6 = vsyncpa [#allocation3], 0  ;;  %s862_s0 = inlined_call_operand.hbm [shape: f32[51,768], index: 0, kind: input, shape index: {}]   ;;  %s863_s1 = inlined_call_operand.hbm [shape: f32[51,768], index: 1, kind: output, shape index: {}]  }
   0x1   :  { %7 = vsyncpa [#allocation4], 0  ;;  %s596_s6 = smov [#allocation2]   ;;  %s548_s10 = scalar_lea.hbm %s862_s0, 5376 }
   0x2   :  { %s13_s7 = sshll.u32 %s596_s6, 4  ;;  %p549_p0 = scmp.ne.s32.totalorder %s862_s0, %s548_s10  ;;  %s14_s7 = int_to_ptr.vmem [resolvable:$true] %s13_s7 }
   0x3   :  { %p552_p1 = scmp.lt.u32.totalorder %s548_s10, %s862_s0 }
   0x5   :  { %p554_p2 = pnand %p552_p1, %p549_p0 }
   0x7   :  { %557 = shalt.err (!%p554_p2)
}
   0x8   :  { %s558_s15 = scalar_lea.vmem %s14_s7, 5376  ;;  %p563_p4 = scmp.lt.s32.totalorder %s14_s7, %s14_s7 }
   0x9   :  { %p559_p3 = scmp.ne.s32.totalorder %s14_s7, %s558_s15  ;;  %p564_p5 = scmp.lt.s32.totalorder %s558_s15, %s558_s15 }
   0xb   :  { %p565_p6 = por %p564_p5, %p563_p4 }
   0xd   :  { %p566_p7 = pnand %p565_p6, %p559_p3 }
   0xf   :  { %569 = shalt.err (!%p566_p7)
}
  0x10   :  { %s597_s16 = smov 768   ;;  %s598_s17 = smov 48  }
  0x11   :  { %19 = dma.hbm_to_vmem [thread:$0]  %s862_s0, 5376, %s14_s7, [#allocation3], %s597_s16, %s597_s16, %s598_s17  }
  0x12   :  { %592 = dma.done.wait [#allocation3], 5376  }
  0x13   :  { %593 = vsyncadd [#allocation3], 4294961920  ;;  %v23_v0 = vld [vmem:[#allocation2] sm:$0xff]  ;;  %v24_v1 = vld [vmem:[#allocation2 + $0x8] sm:$0xff]  ;;  %s599_s0 = smov [#allocation5]  }
  0x14   :  { %v25_v2 = vld [vmem:[#allocation2 + $0x10] sm:$0xff]  ;;  %v65_v3 = vmul.f32 %v23_v0, %v23_v0  ;;  %v66_v4 = vmul.f32 %v24_v1, %v24_v1  ;;  %v26_v5 = vld [vmem:[#allocation2 + $0x18] sm:$0xff]  ;;  %v27_v6 = vld [vmem:[#allocation2 + $0x20] sm:$0xff]  ;;  %v625_v15 = vmul.f32 0.5, %v23_v0  ;;  %v627_v32 = vmul.f32 0.5, %v24_v1  ;;  %s448_s20 = sshll.u32 %s599_s0, 4  ;;  %s449_s20 = int_to_ptr.vmem [resolvable:$true] %s448_s20 }
  0x15   :  { %v28_v7 = vld [vmem:[#allocation2 + $0x28] sm:$0xff]  ;;  %v67_v8 = vmul.f32 %v25_v2, %v25_v2  ;;  %v68_v9 = vmul.f32 %v26_v5, %v26_v5  ;;  %v29_v10 = vld [vmem:[#allocation2 + $0x30] sm:$0xff]  ;;  %v69_v13 = vmul.f32 %v27_v6, %v27_v6  ;;  %v30_v14 = vld [vmem:[#allocation2 + $0x38] sm:$0xff]  ;;  %v629_v40 = vmul.f32 0.5, %v25_v2  ;;  %s570_s21 = scalar_lea.vmem %s449_s20, 5376  ;;  %p575_p9 = scmp.lt.s32.totalorder %s449_s20, %s449_s20 }
  0x16   :  { %v107_v11 = vmul.f32 0.035677407, %v65_v3  ;;  %v108_v12 = vmul.f32 0.035677407, %v66_v4  ;;  %v70_v18 = vmul.f32 %v28_v7, %v28_v7  ;;  %v71_v22 = vmul.f32 %v29_v10, %v29_v10  ;;  %v31_v31 = vld [vmem:[#allocation2 + $0x40] sm:$0xff]  ;;  %v32_v39 = vld [vmem:[#allocation2 + $0x48] sm:$0xff]  ;;  %p571_p8 = scmp.ne.s32.totalorder %s449_s20, %s570_s21  ;;  %p576_p10 = scmp.lt.s32.totalorder %s570_s21, %s570_s21 }
  0x17   :  { %v109_v16 = vmul.f32 0.035677407, %v67_v8  ;;  %v110_v17 = vmul.f32 0.035677407, %v68_v9  ;;  %v111_v21 = vmul.f32 0.035677407, %v69_v13  ;;  %v72_v26 = vmul.f32 %v30_v14, %v30_v14 }
  0x18   :  { %v149_v19 = vadd.f32 0.7978846, %v107_v11  ;;  %v150_v20 = vadd.f32 0.7978846, %v108_v12  ;;  %v112_v25 = vmul.f32 0.035677407, %v70_v18  ;;  %v73_v42 = vmul.f32 %v31_v31, %v31_v31  ;;  %p577_p11 = por %p576_p10, %p575_p9 }
  0x19   :  { %v151_v23 = vadd.f32 0.7978846, %v109_v16  ;;  %v152_v24 = vadd.f32 0.7978846, %v110_v17  ;;  %v153_v29 = vadd.f32 0.7978846, %v111_v21  ;;  %v74_v50 = vmul.f32 %v32_v39, %v32_v39 }
  0x1a   :  { %v191_v27 = vmul.f32 %v149_v19, %v23_v0  ;;  %v192_v28 = vmul.f32 %v150_v20, %v24_v1  ;;  %v113_v30 = vmul.f32 0.035677407, %v71_v22  ;;  %v154_v35 = vadd.f32 0.7978846, %v112_v25  ;;  %v631_v43 = vld [vmem:[#allocation2 + $0x50] sm:$0xff]  ;;  %v635_v47 = vld [vmem:[#allocation2 + $0x58] sm:$0xff]  ;;  %p578_p12 = pnand %p577_p11, %p571_p8 }
  0x1b   :  { %v193_v33 = vmul.f32 %v151_v23, %v25_v2  ;;  %v194_v34 = vmul.f32 %v152_v24, %v26_v5  ;;  %v195_v36 = vmul.f32 %v153_v29, %v27_v6  ;;  %v114_v38 = vmul.f32 0.035677407, %v72_v26  ;;  %v639_v51 = vld [vmem:[#allocation2 + $0x60] sm:$0xff]  ;;  %v647_v58 = vld [vmem:[#allocation2 + $0x68] sm:$0xff]  ;;  %v653_v1 = vld [vmem:[#allocation2 + $0x70] sm:$0xff] }
  0x1c   :  { %464 = vtanh.f32 %v191_v27  ;;  %v155_v37 = vadd.f32 0.7978846, %v113_v30  ;;  %v196_v41 = vmul.f32 %v154_v35, %v28_v7  ;;  %v633_v44 = vmul.f32 0.5, %v26_v5  ;;  %v668_v23 = vld [vmem:[#allocation2 + $0x78] sm:$0xff] }
  0x1d   :  { %466 = vtanh.f32 %v192_v28  ;;  %v156_v46 = vadd.f32 0.7978846, %v114_v38  ;;  %v637_v48 = vmul.f32 0.5, %v27_v6  ;;  %v115_v49 = vmul.f32 0.035677407, %v73_v42  ;;  %v680_v42 = vld [vmem:[#allocation2 + $0x88] sm:$0xff] }
  0x1e   :  { %468 = vtanh.f32 %v193_v33  ;;  %v197_v45 = vmul.f32 %v155_v37, %v29_v10  ;;  %v641_v52 = vmul.f32 0.5, %v28_v7  ;;  %v75_v54 = vmul.f32 %v631_v43, %v631_v43 }
  0x1f   :  { %470 = vtanh.f32 %v194_v34  ;;  %v198_v53 = vmul.f32 %v156_v46, %v30_v14  ;;  %v157_v55 = vadd.f32 0.7978846, %v115_v49  ;;  %v116_v56 = vmul.f32 0.035677407, %v74_v50 }
  0x20   :  { %472 = vtanh.f32 %v195_v36  ;;  %v76_v57 = vmul.f32 %v635_v47, %v635_v47  ;;  %v649_v59 = vmul.f32 0.5, %v29_v10  ;;  %v117_v60 = vmul.f32 0.035677407, %v75_v54 }
  0x21   :  { %474 = vtanh.f32 %v196_v41  ;;  %v77_v61 = vmul.f32 %v639_v51, %v639_v51  ;;  %v199_v62 = vmul.f32 %v157_v55, %v31_v31  ;;  %v158_v63 = vadd.f32 0.7978846, %v116_v56  ;;  %v688_v55 = vld [vmem:[#allocation2 + $0x90] sm:$0xff] }
  0x22   :  { %476 = vtanh.f32 %v197_v45  ;;  %v118_v0 = vmul.f32 0.035677407, %v76_v57  ;;  %v655_v2 = vmul.f32 0.5, %v30_v14  ;;  %v159_v3 = vadd.f32 0.7978846, %v117_v60 }
  0x23   :  { %478 = vtanh.f32 %v198_v53  ;;  %v119_v4 = vmul.f32 0.035677407, %v77_v61  ;;  %v78_v5 = vmul.f32 %v647_v58, %v647_v58  ;;  %v659_v6 = vmul.f32 0.5, %v31_v31  ;;  %v693_v61 = vld [vmem:[#allocation2 + $0x98] sm:$0xff] }
  0x24   :  { %480 = vtanh.f32 %v199_v62  ;;  %v200_v7 = vmul.f32 %v158_v63, %v32_v39  ;;  %v160_v8 = vadd.f32 0.7978846, %v118_v0  ;;  %v201_v10 = vmul.f32 %v159_v3, %v631_v43 }
  0x25   :  { %v161_v11 = vadd.f32 0.7978846, %v119_v4  ;;  %v120_v12 = vmul.f32 0.035677407, %v78_v5  ;;  %v79_v13 = vmul.f32 %v653_v1, %v653_v1  ;;  %v664_v17 = vmul.f32 0.5, %v32_v39 }
  0x26   :  { %v465_v9 = vpop.eup %464  ;;  %482 = vtanh.f32 %v200_v7  ;;  %v202_v18 = vmul.f32 %v160_v8, %v635_v47  ;;  %v80_v37 = vmul.f32 %v668_v23, %v668_v23  ;;  %v243_v41 = vmul.f32 0.5, %v631_v43 }
  0x27   :  { %v467_v14 = vpop.eup %466  ;;  %v317_v16 = vadd.f32 1.0, %v465_v9  ;;  %484 = vtanh.f32 %v201_v10  ;;  %v203_v21 = vmul.f32 %v161_v11, %v639_v51  ;;  %v162_v22 = vadd.f32 0.7978846, %v120_v12 }
  0x28   :  { %v469_v19 = vpop.eup %468  ;;  %v318_v20 = vadd.f32 1.0, %v467_v14  ;;  %486 = vtanh.f32 %v202_v18  ;;  %v121_v27 = vmul.f32 0.035677407, %v79_v13  ;;  %v122_v50 = vmul.f32 0.035677407, %v80_v37  ;;  %v720_v37 = vld [vmem:[#allocation2 + $0xb8] sm:$0xff] }
  0x29   :  { %v471_v24 = vpop.eup %470  ;;  %v359_v25 = vmul.f32 %v317_v16, %v625_v15  ;;  %v319_v26 = vadd.f32 1.0, %v469_v19  ;;  %488 = vtanh.f32 %v203_v21  ;;  %v204_v31 = vmul.f32 %v162_v22, %v647_v58  ;;  %v676_v15 = vld [vmem:[#allocation2 + $0x80] sm:$0xff] }
  0x2a   :  { %v473_v28 = vpop.eup %472  ;;  %v360_v29 = vmul.f32 %v318_v20, %v627_v32  ;;  %v320_v30 = vadd.f32 1.0, %v471_v24  ;;  %v163_v36 = vadd.f32 0.7978846, %v121_v27  ;;  %v81_v43 = vmul.f32 %v676_v15, %v676_v15  ;;  %v707_v24 = vld [vmem:[#allocation2 + $0xa0] sm:$0xff] }
  0x2b   :  { %v475_v33 = vpop.eup %474  ;;  %401 = vst [vmem:[#allocation5] sm:$0xff] %v359_v25  ;;  %v361_v34 = vmul.f32 %v319_v26, %v629_v40  ;;  %v321_v35 = vadd.f32 1.0, %v473_v28  ;;  %490 = vtanh.f32 %v204_v31  ;;  %v82_v60 = vmul.f32 %v680_v42, %v680_v42  ;;  %v709_v25 = vld [vmem:[#allocation2 + $0xa8] sm:$0xff] }
  0x2c   :  { %v477_v38 = vpop.eup %476  ;;  %402 = vst [vmem:[#allocation5 + $0x8] sm:$0xff] %v360_v29  ;;  %v362_v39 = vmul.f32 %v320_v30, %v633_v44  ;;  %v322_v32 = vadd.f32 1.0, %v475_v33  ;;  %v205_v49 = vmul.f32 %v163_v36, %v653_v1  ;;  %v244_v44 = vmul.f32 0.5, %v635_v47  ;;  %v711_v29 = vld [vmem:[#allocation2 + $0xb0] sm:$0xff] }
  0x2d   :  { %v479_v45 = vpop.eup %478  ;;  %403 = vst [vmem:[#allocation5 + $0x10] sm:$0xff] %v361_v34  ;;  %v363_v40 = vmul.f32 %v321_v35, %v637_v48  ;;  %v323_v46 = vadd.f32 1.0, %v477_v38  ;;  %v164_v48 = vadd.f32 0.7978846, %v122_v50  ;;  %v245_v62 = vmul.f32 0.5, %v639_v51 }
  0x2e   :  { %404 = vst [vmem:[#allocation5 + $0x18] sm:$0xff] %v362_v39  ;;  %v364_v53 = vmul.f32 %v322_v32, %v641_v52  ;;  %v324_v54 = vadd.f32 1.0, %v479_v45  ;;  %v481_v56 = vpop.eup %480  ;;  %492 = vtanh.f32 %v205_v49  ;;  %v123_v63 = vmul.f32 0.035677407, %v81_v43 }
  0x2f   :  { %405 = vst [vmem:[#allocation5 + $0x20] sm:$0xff] %v363_v40  ;;  %v365_v57 = vmul.f32 %v323_v46, %v649_v59  ;;  %v325_v47 = vadd.f32 1.0, %v481_v56  ;;  %v246_v3 = vmul.f32 0.5, %v647_v58  ;;  %v206_v59 = vmul.f32 %v164_v48, %v668_v23  ;;  %v726_v46 = vld [vmem:[#allocation2 + $0xc8] sm:$0xff] }
  0x30   :  { %406 = vst [vmem:[#allocation5 + $0x28] sm:$0xff] %v364_v53  ;;  %v366_v52 = vmul.f32 %v324_v54, %v655_v2  ;;  %v483_v0 = vpop.eup %482  ;;  %v124_v4 = vmul.f32 0.035677407, %v82_v60  ;;  %v83_v5 = vmul.f32 %v688_v55, %v688_v55  ;;  %v165_v2 = vadd.f32 0.7978846, %v123_v63 }
  0x31   :  { %407 = vst [vmem:[#allocation5 + $0x30] sm:$0xff] %v365_v57  ;;  %v485_v7 = vpop.eup %484  ;;  %v367_v8 = vmul.f32 %v325_v47, %v659_v6  ;;  %v326_v9 = vadd.f32 1.0, %v483_v0  ;;  %v84_v51 = vmul.f32 %v693_v61, %v693_v61  ;;  %494 = vtanh.f32 %v206_v59 }
  0x32   :  { %408 = vst [vmem:[#allocation5 + $0x38] sm:$0xff] %v366_v52  ;;  %v487_v10 = vpop.eup %486  ;;  %v327_v11 = vadd.f32 1.0, %v485_v7  ;;  %v166_v12 = vadd.f32 0.7978846, %v124_v4  ;;  %v125_v58 = vmul.f32 0.035677407, %v83_v5  ;;  %v207_v18 = vmul.f32 %v165_v2, %v676_v15 }
  0x33   :  { %v489_v13 = vpop.eup %488  ;;  %409 = vst [vmem:[#allocation5 + $0x40] sm:$0xff] %v367_v8  ;;  %v368_v14 = vmul.f32 %v326_v9, %v664_v17  ;;  %v328_v16 = vadd.f32 1.0, %v487_v10  ;;  %v126_v19 = vmul.f32 0.035677407, %v84_v51  ;;  %v247_v33 = vmul.f32 0.5, %v653_v1 }
  0x34   :  { %v369_v20 = vmul.f32 %v327_v11, %v243_v41  ;;  %v329_v6 = vadd.f32 1.0, %v489_v13  ;;  %v208_v21 = vmul.f32 %v166_v12, %v680_v42  ;;  %v167_v22 = vadd.f32 0.7978846, %v125_v58  ;;  %v724_v41 = vld [vmem:[#allocation2 + $0xc0] sm:$0xff] }
  0x35   :  { %v491_v26 = vpop.eup %490  ;;  %410 = vst [vmem:[#allocation5 + $0x48] sm:$0xff] %v368_v14  ;;  %v370_v27 = vmul.f32 %v328_v16, %v244_v44  ;;  %496 = vtanh.f32 %v207_v18  ;;  %v168_v28 = vadd.f32 0.7978846, %v126_v19  ;;  %v85_v35 = vmul.f32 %v707_v24, %v707_v24  ;;  %v747_v14 = vld [vmem:[#allocation2 + $0xd8] sm:$0xff] }
  0x36   :  { %411 = vst [vmem:[#allocation5 + $0x50] sm:$0xff] %v369_v20  ;;  %v371_v17 = vmul.f32 %v329_v6, %v245_v62  ;;  %v330_v30 = vadd.f32 1.0, %v491_v26  ;;  %498 = vtanh.f32 %v208_v21  ;;  %v209_v31 = vmul.f32 %v167_v22, %v688_v55  ;;  %v737_v62 = vld [vmem:[#allocation2 + $0xd0] sm:$0xff]  ;;  %v751_v6 = vld [vmem:[#allocation2 + $0xe0] sm:$0xff] }
  0x37   :  { %412 = vst [vmem:[#allocation5 + $0x58] sm:$0xff] %v370_v27  ;;  %v210_v34 = vmul.f32 %v168_v28, %v693_v61  ;;  %v86_v36 = vmul.f32 %v709_v25, %v709_v25  ;;  %v87_v32 = vmul.f32 %v711_v29, %v711_v29  ;;  %v127_v45 = vmul.f32 0.035677407, %v85_v35  ;;  %v753_v28 = vld [vmem:[#allocation2 + $0xe8] sm:$0xff] }
  0x38   :  { %v493_v38 = vpop.eup %492  ;;  %413 = vst [vmem:[#allocation5 + $0x60] sm:$0xff] %v371_v17  ;;  %v372_v39 = vmul.f32 %v330_v30, %v246_v3  ;;  %500 = vtanh.f32 %v209_v31  ;;  %v248_v49 = vmul.f32 0.5, %v668_v23  ;;  %v249_v50 = vmul.f32 0.5, %v676_v15  ;;  %v758_v31 = vld [vmem:[#allocation2 + $0xf0] sm:$0xff] }
  0x39   :  { %v331_v1 = vadd.f32 1.0, %v493_v38  ;;  %502 = vtanh.f32 %v210_v34  ;;  %v128_v40 = vmul.f32 0.035677407, %v86_v36  ;;  %v129_v53 = vmul.f32 0.035677407, %v87_v32  ;;  %v764_v38 = vld [vmem:[#allocation2 + $0xf8] sm:$0xff] }
  0x3a   :  { %414 = vst [vmem:[#allocation5 + $0x68] sm:$0xff] %v372_v39  ;;  %v88_v54 = vmul.f32 %v720_v37, %v720_v37  ;;  %v169_v43 = vadd.f32 0.7978846, %v127_v45  ;;  %v89_v57 = vmul.f32 %v724_v41, %v724_v41  ;;  %v250_v60 = vmul.f32 0.5, %v680_v42  ;;  %v769_v45 = vld [vmem:[#allocation2 + $0x100] sm:$0xff] }
  0x3b   :  { %v373_v44 = vmul.f32 %v331_v1, %v247_v33  ;;  %v170_v56 = vadd.f32 0.7978846, %v128_v40  ;;  %v495_v48 = vpop.eup %494  ;;  %v171_v52 = vadd.f32 0.7978846, %v129_v53  ;;  %v90_v23 = vmul.f32 %v726_v46, %v726_v46 }
  0x3c   :  { %v130_v47 = vmul.f32 0.035677407, %v88_v54  ;;  %v332_v15 = vadd.f32 1.0, %v495_v48  ;;  %v211_v63 = vmul.f32 %v169_v43, %v707_v24  ;;  %v131_v3 = vmul.f32 0.035677407, %v89_v57 }
  0x3d   :  { %415 = vst [vmem:[#allocation5 + $0x70] sm:$0xff] %v373_v44  ;;  %v212_v0 = vmul.f32 %v170_v56, %v709_v25  ;;  %v251_v59 = vmul.f32 0.5, %v688_v55  ;;  %v213_v4 = vmul.f32 %v171_v52, %v711_v29  ;;  %v132_v42 = vmul.f32 0.035677407, %v90_v23 }
  0x3e   :  { %v172_v5 = vadd.f32 0.7978846, %v130_v47  ;;  %v374_v8 = vmul.f32 %v332_v15, %v248_v49  ;;  %504 = vtanh.f32 %v211_v63  ;;  %v173_v9 = vadd.f32 0.7978846, %v131_v3 }
  0x3f   :  { %v497_v7 = vpop.eup %496  ;;  %v91_v2 = vmul.f32 %v737_v62, %v737_v62  ;;  %506 = vtanh.f32 %v212_v0  ;;  %v174_v12 = vadd.f32 0.7978846, %v132_v42  ;;  %v252_v19 = vmul.f32 0.5, %v693_v61 }
  0x40   :  { %v499_v51 = vpop.eup %498  ;;  %v333_v10 = vadd.f32 1.0, %v497_v7  ;;  %v214_v11 = vmul.f32 %v172_v5, %v720_v37  ;;  %416 = vst [vmem:[#allocation5 + $0x78] sm:$0xff] %v374_v8  ;;  %508 = vtanh.f32 %v213_v4  ;;  %v215_v55 = vmul.f32 %v173_v9, %v724_v41 }
  0x41   :  { %v334_v58 = vadd.f32 1.0, %v499_v51  ;;  %v133_v13 = vmul.f32 0.035677407, %v91_v2  ;;  %v216_v20 = vmul.f32 %v174_v12, %v726_v46  ;;  %v253_v30 = vmul.f32 0.5, %v707_v24  ;;  %v784_v2 = vld [vmem:[#allocation2 + $0x108] sm:$0xff] }
  0x42   :  { %v501_v16 = vpop.eup %500  ;;  %v375_v18 = vmul.f32 %v333_v10, %v249_v50  ;;  %510 = vtanh.f32 %v214_v11  ;;  %v92_v61 = vmul.f32 %v747_v14, %v747_v14  ;;  %v254_v34 = vmul.f32 0.5, %v709_v25 }
  0x43   :  { %v503_v21 = vpop.eup %502  ;;  %v376_v22 = vmul.f32 %v334_v58, %v250_v60  ;;  %v335_v26 = vadd.f32 1.0, %v501_v16  ;;  %512 = vtanh.f32 %v215_v55  ;;  %v175_v27 = vadd.f32 0.7978846, %v133_v13  ;;  %v786_v58 = vld [vmem:[#allocation2 + $0x110] sm:$0xff] }
  0x44   :  { %417 = vst [vmem:[#allocation5 + $0x80] sm:$0xff] %v375_v18  ;;  %v336_v17 = vadd.f32 1.0, %v503_v21  ;;  %514 = vtanh.f32 %v216_v20  ;;  %v93_v36 = vmul.f32 %v751_v6, %v751_v6  ;;  %v255_v24 = vmul.f32 0.5, %v711_v29  ;;  %v788_v18 = vld [vmem:[#allocation2 + $0x118] sm:$0xff] }
  0x45   :  { %418 = vst [vmem:[#allocation5 + $0x88] sm:$0xff] %v376_v22  ;;  %v377_v33 = vmul.f32 %v335_v26, %v251_v59  ;;  %v217_v35 = vmul.f32 %v175_v27, %v737_v62  ;;  %v134_v32 = vmul.f32 0.035677407, %v92_v61  ;;  %v94_v1 = vmul.f32 %v753_v28, %v753_v28  ;;  %v794_v26 = vld [vmem:[#allocation2 + $0x120] sm:$0x7] }
  0x46   :  { %v378_v39 = vmul.f32 %v336_v17, %v252_v19  ;;  %v256_v40 = vmul.f32 0.5, %v720_v37  ;;  %v135_v25 = vmul.f32 0.035677407, %v93_v36  ;;  %v95_v49 = vmul.f32 %v758_v31, %v758_v31  ;;  %v802_v36 = vld [vmem:[#allocation2 + $0x128] sm:$0x7] }
  0x47   :  { %419 = vst [vmem:[#allocation5 + $0x90] sm:$0xff] %v377_v33  ;;  %516 = vtanh.f32 %v217_v35  ;;  %v257_v50 = vmul.f32 0.5, %v724_v41  ;;  %v176_v53 = vadd.f32 0.7978846, %v134_v32  ;;  %v136_v54 = vmul.f32 0.035677407, %v94_v1 }
  0x48   :  { %420 = vst [vmem:[#allocation5 + $0x98] sm:$0xff] %v378_v39  ;;  %v96_v29 = vmul.f32 %v764_v38, %v764_v38  ;;  %v505_v44 = vpop.eup %504  ;;  %v258_v43 = vmul.f32 0.5, %v726_v46  ;;  %v177_v56 = vadd.f32 0.7978846, %v135_v25  ;;  %v137_v57 = vmul.f32 0.035677407, %v95_v49 }
  0x49   :  { %v97_v37 = vmul.f32 %v769_v45, %v769_v45  ;;  %v507_v48 = vpop.eup %506  ;;  %v337_v60 = vadd.f32 1.0, %v505_v44  ;;  %v218_v52 = vmul.f32 %v176_v53, %v747_v14  ;;  %v178_v47 = vadd.f32 0.7978846, %v136_v54  ;;  %v807_v32 = vld [vmem:[#allocation2 + $0x130] sm:$0x7] }
  0x4a   :  { %v138_v23 = vmul.f32 0.035677407, %v96_v29  ;;  %v509_v41 = vpop.eup %508  ;;  %v338_v15 = vadd.f32 1.0, %v507_v48  ;;  %v219_v63 = vmul.f32 %v177_v56, %v751_v6  ;;  %v179_v0 = vadd.f32 0.7978846, %v137_v57 }
  0x4b   :  { %v139_v3 = vmul.f32 0.035677407, %v97_v37  ;;  %v379_v4 = vmul.f32 %v337_v60, %v253_v30  ;;  %v339_v46 = vadd.f32 1.0, %v509_v41  ;;  %518 = vtanh.f32 %v218_v52 }
  0x4c   :  { %v511_v59 = vpop.eup %510  ;;  %v220_v5 = vmul.f32 %v178_v47, %v753_v28  ;;  %v380_v7 = vmul.f32 %v338_v15, %v254_v34  ;;  %520 = vtanh.f32 %v219_v63  ;;  %v221_v9 = vmul.f32 %v179_v0, %v758_v31  ;;  %v819_v15 = vld [vmem:[#allocation2 + $0x138] sm:$0x7] }
  0x4d   :  { %v513_v42 = vpop.eup %512  ;;  %v340_v8 = vadd.f32 1.0, %v511_v59  ;;  %421 = vst [vmem:[#allocation5 + $0xa0] sm:$0xff] %v379_v4  ;;  %v381_v10 = vmul.f32 %v339_v46, %v255_v24  ;;  %v180_v12 = vadd.f32 0.7978846, %v138_v23  ;;  %v181_v16 = vadd.f32 0.7978846, %v139_v3 }
  0x4e   :  { %v515_v51 = vpop.eup %514  ;;  %v341_v11 = vadd.f32 1.0, %v513_v42  ;;  %522 = vtanh.f32 %v220_v5  ;;  %422 = vst [vmem:[#allocation5 + $0xa8] sm:$0xff] %v380_v7  ;;  %v259_v20 = vmul.f32 0.5, %v737_v62  ;;  %v98_v22 = vmul.f32 %v784_v2, %v784_v2  ;;  %v822_v59 = vld [vmem:[#allocation2 + $0x140] sm:$0x7] }
  0x4f   :  { %v382_v55 = vmul.f32 %v340_v8, %v256_v40  ;;  %v342_v13 = vadd.f32 1.0, %v515_v51  ;;  %524 = vtanh.f32 %v221_v9  ;;  %423 = vst [vmem:[#allocation5 + $0xb0] sm:$0xff] %v381_v10  ;;  %v222_v21 = vmul.f32 %v180_v12, %v764_v38  ;;  %v826_v9 = vld [vmem:[#allocation2 + $0x148] sm:$0x7] }
  0x50   :  { %v383_v19 = vmul.f32 %v341_v11, %v257_v50  ;;  %v260_v30 = vmul.f32 0.5, %v747_v14  ;;  %v223_v61 = vmul.f32 %v181_v16, %v769_v45  ;;  %v99_v33 = vmul.f32 %v786_v58, %v786_v58 }
  0x51   :  { %v517_v27 = vpop.eup %516  ;;  %424 = vst [vmem:[#allocation5 + $0xb8] sm:$0xff] %v382_v55  ;;  %v384_v17 = vmul.f32 %v342_v13, %v258_v43  ;;  %526 = vtanh.f32 %v222_v21  ;;  %v140_v62 = vmul.f32 0.035677407, %v98_v22  ;;  %v100_v35 = vmul.f32 %v788_v18, %v788_v18 }
  0x52   :  { %425 = vst [vmem:[#allocation5 + $0xc0] sm:$0xff] %v383_v19  ;;  %v343_v34 = vadd.f32 1.0, %v517_v27  ;;  %v261_v39 = vmul.f32 0.5, %v751_v6  ;;  %528 = vtanh.f32 %v223_v61  ;;  %v141_v24 = vmul.f32 0.035677407, %v99_v33 }
  0x53   :  { %426 = vst [vmem:[#allocation5 + $0xc8] sm:$0xff] %v384_v17  ;;  %v101_v14 = vmul.f32 %v794_v26, %v794_v26  ;;  %v262_v40 = vmul.f32 0.5, %v753_v28  ;;  %v182_v25 = vadd.f32 0.7978846, %v140_v62  ;;  %v142_v49 = vmul.f32 0.035677407, %v100_v35 }
  0x54   :  { %v385_v1 = vmul.f32 %v343_v34, %v259_v20  ;;  %v263_v50 = vmul.f32 0.5, %v758_v31  ;;  %v183_v53 = vadd.f32 0.7978846, %v141_v24  ;;  %v102_v29 = vmul.f32 %v802_v36, %v802_v36 }
  0x55   :  { %v143_v54 = vmul.f32 0.035677407, %v101_v14  ;;  %v519_v6 = vpop.eup %518  ;;  %v264_v44 = vmul.f32 0.5, %v764_v38  ;;  %v224_v43 = vmul.f32 %v182_v25, %v784_v2  ;;  %v184_v56 = vadd.f32 0.7978846, %v142_v49 }
  0x56   :  { %427 = vst [vmem:[#allocation5 + $0xd0] sm:$0xff] %v385_v1  ;;  %v103_v57 = vmul.f32 %v807_v32, %v807_v32  ;;  %v521_v28 = vpop.eup %520  ;;  %v344_v37 = vadd.f32 1.0, %v519_v6  ;;  %v225_v48 = vmul.f32 %v183_v53, %v786_v58  ;;  %v144_v60 = vmul.f32 0.035677407, %v102_v29 }
  0x57   :  { %v185_v31 = vadd.f32 0.7978846, %v143_v54  ;;  %v345_v47 = vadd.f32 1.0, %v521_v28  ;;  %530 = vtanh.f32 %v224_v43  ;;  %v226_v23 = vmul.f32 %v184_v56, %v788_v18 }
  0x58   :  { %v523_v52 = vpop.eup %522  ;;  %v145_v41 = vmul.f32 0.035677407, %v103_v57  ;;  %v386_v63 = vmul.f32 %v344_v37, %v260_v30  ;;  %532 = vtanh.f32 %v225_v48  ;;  %v186_v5 = vadd.f32 0.7978846, %v144_v60 }
  0x59   :  { %v525_v38 = vpop.eup %524  ;;  %v346_v0 = vadd.f32 1.0, %v523_v52  ;;  %v227_v3 = vmul.f32 %v185_v31, %v794_v26  ;;  %v387_v4 = vmul.f32 %v345_v47, %v261_v39  ;;  %534 = vtanh.f32 %v226_v23 }
  0x5a   :  { %v347_v46 = vadd.f32 1.0, %v525_v38  ;;  %428 = vst [vmem:[#allocation5 + $0xd8] sm:$0xff] %v386_v63  ;;  %v187_v7 = vadd.f32 0.7978846, %v145_v41  ;;  %v104_v8 = vmul.f32 %v819_v15, %v819_v15  ;;  %v265_v11 = vmul.f32 0.5, %v769_v45 }
  0x5b   :  { %v388_v42 = vmul.f32 %v346_v0, %v262_v40  ;;  %536 = vtanh.f32 %v227_v3  ;;  %v527_v51 = vpop.eup %526  ;;  %429 = vst [vmem:[#allocation5 + $0xe0] sm:$0xff] %v387_v4  ;;  %v228_v12 = vmul.f32 %v186_v5, %v802_v36  ;;  %v105_v55 = vmul.f32 %v822_v59, %v822_v59 }
  0x5c   :  { %v389_v10 = vmul.f32 %v347_v46, %v263_v50  ;;  %v529_v13 = vpop.eup %528  ;;  %v348_v16 = vadd.f32 1.0, %v527_v51  ;;  %v229_v19 = vmul.f32 %v187_v7, %v807_v32  ;;  %v146_v20 = vmul.f32 0.035677407, %v104_v8 }
  0x5d   :  { %430 = vst [vmem:[#allocation5 + $0xe8] sm:$0xff] %v388_v42  ;;  %v349_v21 = vadd.f32 1.0, %v529_v13  ;;  %538 = vtanh.f32 %v228_v12  ;;  %v147_v22 = vmul.f32 0.035677407, %v105_v55  ;;  %v106_v27 = vmul.f32 %v826_v9, %v826_v9 }
  0x5e   :  { %431 = vst [vmem:[#allocation5 + $0xf0] sm:$0xff] %v389_v10  ;;  %v390_v17 = vmul.f32 %v348_v16, %v264_v44  ;;  %540 = vtanh.f32 %v229_v19  ;;  %v188_v45 = vadd.f32 0.7978846, %v146_v20  ;;  %v266_v34 = vmul.f32 0.5, %v784_v2 }
  0x5f   :  { %v391_v30 = vmul.f32 %v349_v21, %v265_v11  ;;  %v189_v61 = vadd.f32 0.7978846, %v147_v22  ;;  %v148_v33 = vmul.f32 0.035677407, %v106_v27  ;;  %v267_v39 = vmul.f32 0.5, %v786_v58 }
  0x60   :  { %432 = vst [vmem:[#allocation5 + $0xf8] sm:$0xff] %v390_v17  ;;  %v230_v62 = vmul.f32 %v188_v45, %v819_v15  ;;  %v268_v25 = vmul.f32 0.5, %v788_v18  ;;  %v269_v53 = vmul.f32 0.5, %v794_v26  ;;  %v270_v56 = vmul.f32 0.5, %v802_v36 }
  0x61   :  { %v531_v35 = vpop.eup %530  ;;  %433 = vst [vmem:[#allocation5 + $0x100] sm:$0xff] %v391_v30  ;;  %v231_v24 = vmul.f32 %v189_v61, %v822_v59  ;;  %v190_v14 = vadd.f32 0.7978846, %v148_v33  ;;  %v271_v28 = vmul.f32 0.5, %v807_v32  ;;  %v272_v52 = vmul.f32 0.5, %v819_v15 }
  0x62   :  { %v533_v1 = vpop.eup %532  ;;  %v350_v40 = vadd.f32 1.0, %v531_v35  ;;  %542 = vtanh.f32 %v230_v62  ;;  %v273_v23 = vmul.f32 0.5, %v822_v59  ;;  %v274_v63 = vmul.f32 0.5, %v826_v9 }
  0x63   :  { %v535_v49 = vpop.eup %534  ;;  %v351_v50 = vadd.f32 1.0, %v533_v1  ;;  %544 = vtanh.f32 %v231_v24  ;;  %v232_v2 = vmul.f32 %v190_v14, %v826_v9 }
  0x64   :  { %v392_v29 = vmul.f32 %v350_v40, %v266_v34  ;;  %v352_v6 = vadd.f32 1.0, %v535_v49 }
  0x65   :  { %v537_v54 = vpop.eup %536  ;;  %v393_v44 = vmul.f32 %v351_v50, %v267_v39  ;;  %546 = vtanh.f32 %v232_v2 }
  0x66   :  { %v353_v58 = vadd.f32 1.0, %v537_v54  ;;  %434 = vst [vmem:[#allocation5 + $0x108] sm:$0xff] %v392_v29  ;;  %v394_v43 = vmul.f32 %v352_v6, %v268_v25 }
  0x67   :  { %v539_v57 = vpop.eup %538  ;;  %435 = vst [vmem:[#allocation5 + $0x110] sm:$0xff] %v393_v44 }
  0x68   :  { %v395_v18 = vmul.f32 %v353_v58, %v269_v53  ;;  %v541_v37 = vpop.eup %540  ;;  %436 = vst [vmem:[#allocation5 + $0x118] sm:$0xff] %v394_v43  ;;  %v354_v26 = vadd.f32 1.0, %v539_v57 }
  0x69   :  { %v355_v48 = vadd.f32 1.0, %v541_v37 }
  0x6a   :  { %437 = vst [vmem:[#allocation5 + $0x120] sm:$0x7] %v395_v18  ;;  %v396_v31 = vmul.f32 %v354_v26, %v270_v56 }
  0x6b   :  { %v397_v60 = vmul.f32 %v355_v48, %v271_v28 }
  0x6c   :  { %v543_v47 = vpop.eup %542  ;;  %438 = vst [vmem:[#allocation5 + $0x128] sm:$0x7] %v396_v31 }
  0x6d   :  { %v545_v41 = vpop.eup %544  ;;  %439 = vst [vmem:[#allocation5 + $0x130] sm:$0x7] %v397_v60  ;;  %v356_v36 = vadd.f32 1.0, %v543_v47 }
  0x6e   :  { %v357_v38 = vadd.f32 1.0, %v545_v41 }
  0x6f   :  { %v547_v32 = vpop.eup %546  ;;  %v398_v0 = vmul.f32 %v356_v36, %v272_v52 }
  0x70   :  { %v399_v3 = vmul.f32 %v357_v38, %v273_v23  ;;  %v358_v4 = vadd.f32 1.0, %v547_v32 }
  0x71   :  { %440 = vst [vmem:[#allocation5 + $0x138] sm:$0x7] %v398_v0 }
  0x72   :  { %441 = vst [vmem:[#allocation5 + $0x140] sm:$0x7] %v399_v3  ;;  %v400_v46 = vmul.f32 %v358_v4, %v274_v63 }
  0x74   :  { %442 = vst [vmem:[#allocation5 + $0x148] sm:$0x7] %v400_v46 }
  0x75   :  { %581 = shalt.err (!%p578_p12)
}
  0x76   :  { %s582_s24 = scalar_lea.hbm %s863_s1, 5376 }
  0x77   :  { %p583_p13 = scmp.ne.s32.totalorder %s863_s1, %s582_s24  ;;  %p586_p0 = scmp.lt.u32.totalorder %s582_s24, %s863_s1 }
  0x79   :  { %p588_p1 = pnand %p586_p0, %p583_p13 }
  0x7b   :  { %591 = shalt.err (!%p588_p1)
}
  0x7c   :  { %454 = dma.vmem_to_hbm [thread:$0]  %s449_s20, 5376, %s863_s1, [#allocation4], %s597_s16, %s597_s16, %s598_s17  }
  0x7d   :  { %594 = dma.done.wait [#allocation4], 5376  }
  0x7e   :  { %595 = vsyncadd [#allocation4], 4294961920 }
  0x7f   :  { %458 = vsyncpa [#allocation3], 1 }
  0x80   :  { %459 = vsyncpa [#allocation4], 1 }

</bundles_post_ra>
